<compile_context>
chip_gen: v7x
topology: tpu7x:2x2x1
jax: 0.10.0
libtpu: 0.0.40
codegen_flags: <defaults>
</compile_context>

<pallas_src>
import jax
import jax.numpy as jnp
from jax.experimental import pallas as pl
from jax.experimental.pallas import tpu as pltpu

VOCAB_SIZE = 1000
EMBEDDING_DIM = 16
HIDDEN_DIM = 32
OUTPUT_DIM = 10

MAX_TILE_M = 512  # rows per grid step (multiple of 8); fits all TPU generations


def _round_up(x, m):
    return ((x + m - 1) // m) * m


def _fused_linear_kernel(x_ref, w_ref, b_ref, o_ref):
    # x: (TM, E), w: (E, O) folded = w1 @ w2, b: (1, O) folded = b1 @ w2 + b2.
    o_ref[...] = (
        jnp.dot(x_ref[...], w_ref[...], preferred_element_type=jnp.float32)
        + b_ref[...]
    ).astype(o_ref.dtype)


def simple_model_forward(token_ids, params):
    """token_ids: (batch, seq) int32 -> (batch, seq, OUTPUT_DIM) float32."""
    emb_table = params["embedding"]
    w1, b1, w2, b2 = params["w1"], params["b1"], params["w2"], params["b2"]

    batch, seq = token_ids.shape
    M = batch * seq

    # Fold the two linear layers once at trace time (constant-folded under jit).
    w_folded = jnp.dot(w1, w2, preferred_element_type=jnp.float32)          # (E, O)
    b_folded = (
        jnp.dot(b1.reshape(1, HIDDEN_DIM), w2, preferred_element_type=jnp.float32)
        + b2.reshape(1, OUTPUT_DIM)
    )                                                                        # (1, O)

    # Embedding lookup (pure indexing glue) in plain JAX -> (M, E) activations.
    x = jnp.take(emb_table, token_ids.reshape(-1), axis=0)

    # Tile over M; pad rows so the grid divides evenly (padded rows sliced off).
    tile_m = min(MAX_TILE_M, _round_up(M, 8))
    m_pad = _round_up(M, tile_m)
    if m_pad != M:
        x = jnp.pad(x, ((0, m_pad - M), (0, 0)))

    grid = (m_pad // tile_m,)

    out = pl.pallas_call(
        _fused_linear_kernel,
        out_shape=jax.ShapeDtypeStruct((m_pad, OUTPUT_DIM), jnp.float32),
        grid=grid,
        in_specs=[
            pl.BlockSpec((tile_m, EMBEDDING_DIM), lambda i: (i, 0)),
            pl.BlockSpec((EMBEDDING_DIM, OUTPUT_DIM), lambda i: (0, 0)),
            pl.BlockSpec((1, OUTPUT_DIM), lambda i: (0, 0)),
        ],
        out_specs=pl.BlockSpec((tile_m, OUTPUT_DIM), lambda i: (i, 0)),
        compiler_params=pltpu.CompilerParams(
            dimension_semantics=("parallel",),
        ),
    )(x, w_folded, b_folded)

    return out[:M].reshape(batch, seq, OUTPUT_DIM)


def init_params(key):
    """Deterministic init mirroring PyTorch defaults (Embedding ~ N(0,1),
    Linear ~ U(-1/sqrt(fan_in), 1/sqrt(fan_in)))."""
    k_emb, k_w1, k_b1, k_w2, k_b2 = jax.random.split(key, 5)
    emb = jax.random.normal(k_emb, (VOCAB_SIZE, EMBEDDING_DIM), jnp.float32)

    bound1 = 1.0 / jnp.sqrt(EMBEDDING_DIM)
    w1 = jax.random.uniform(
        k_w1, (EMBEDDING_DIM, HIDDEN_DIM), jnp.float32, -bound1, bound1
    )
    b1 = jax.random.uniform(k_b1, (HIDDEN_DIM,), jnp.float32, -bound1, bound1)

    bound2 = 1.0 / jnp.sqrt(HIDDEN_DIM)
    w2 = jax.random.uniform(
        k_w2, (HIDDEN_DIM, OUTPUT_DIM), jnp.float32, -bound2, bound2
    )
    b2 = jax.random.uniform(k_b2, (OUTPUT_DIM,), jnp.float32, -bound2, bound2)

    return {"embedding": emb, "w1": w1, "b1": b1, "w2": w2, "b2": b2}


if __name__ == "__main__":
    key = jax.random.PRNGKey(0)
    k_params, k_tok1, k_tok2 = jax.random.split(key, 3)
    params = init_params(k_params)

    def reference(token_ids):
        # Unfolded reference (same math as the PyTorch module).
        e = jnp.take(params["embedding"], token_ids.reshape(-1), axis=0)
        r = (e @ params["w1"] + params["b1"]) @ params["w2"] + params["b2"]
        return r.reshape(token_ids.shape[0], token_ids.shape[1], OUTPUT_DIM)

    # Small case from the module spec: batch=2, seq=8.
    batch, seq = 2, 8
    tok = jax.random.randint(
        k_tok1, (batch, seq), minval=0, maxval=VOCAB_SIZE, dtype=jnp.int32
    )
    out = jax.block_until_ready(simple_model_forward(tok, params))
    assert out.shape == (batch, seq, OUTPUT_DIM)
    assert jnp.allclose(out, reference(tok), atol=1e-5, rtol=1e-5)

    # Slightly larger case exercising the multi-tile grid + M padding path
    # (M=1200 -> TM=512, padded to 1536, grid=(3,)).
    batch2, seq2 = 4, 300
    tok2 = jax.random.randint(
        k_tok2, (batch2, seq2), minval=0, maxval=VOCAB_SIZE, dtype=jnp.int32
    )
    out2 = jax.block_until_ready(simple_model_forward(tok2, params))
    assert out2.shape == (batch2, seq2, OUTPUT_DIM)
    assert jnp.allclose(out2, reference(tok2), atol=1e-5, rtol=1e-5)

    print("KERNEL_OK")
</pallas_src>

<mosaic_0001>
module attributes {stable_mosaic.version = 11 : i64} {
  func.func @_fused_linear_kernel(%arg0: i32, %arg1: memref<16x16xf32, #tpu.memory_space<vmem>>, %arg2: memref<16x10xf32, #tpu.memory_space<vmem>>, %arg3: memref<1x10xf32, #tpu.memory_space<vmem>>, %arg4: memref<16x10xf32, #tpu.memory_space<vmem>>) attributes {dimension_semantics = [#tpu.dimension_semantics<parallel>], iteration_bounds = array<i64: 1>, scalar_prefetch = 0 : i64, scratch_operands = 0 : i64, tpu.core_type = #tpu.core_type<tc>, window_params = [{transform_indices = @transform_0, window_bounds = array<i64: 16, 16>}, {pipeline_mode = #tpu.pipeline_mode<synchronous>, transform_indices = @transform_1, window_bounds = array<i64: 16, 10>}, {pipeline_mode = #tpu.pipeline_mode<synchronous>, transform_indices = @transform_2, window_bounds = array<i64: 1, 10>}, {transform_indices = @transform_3, window_bounds = array<i64: 16, 10>}]} {
    %c0 = arith.constant 0 : index
    %c0_0 = arith.constant 0 : index
    %0 = vector.load %arg1[%c0, %c0_0] : memref<16x16xf32, #tpu.memory_space<vmem>>, vector<16x16xf32>
    %c0_1 = arith.constant 0 : index
    %c0_2 = arith.constant 0 : index
    %1 = vector.load %arg2[%c0_1, %c0_2] : memref<16x10xf32, #tpu.memory_space<vmem>>, vector<16x10xf32>
    %cst = arith.constant dense<0.000000e+00> : vector<16x10xf32>
    %2 = tpu.matmul %0, %1, %cst {dimension_numbers = #tpu.dot_dimension_numbers<[1], [0], [0], [1], [0, 0, 1, 1], [], []>} : vector<16x16xf32>, vector<16x10xf32>, vector<16x10xf32> -> vector<16x10xf32>
    %c0_3 = arith.constant 0 : index
    %c0_4 = arith.constant 0 : index
    %3 = vector.load %arg3[%c0_3, %c0_4] : memref<1x10xf32, #tpu.memory_space<vmem>>, vector<1x10xf32>
    %4 = vector.broadcast %3 : vector<1x10xf32> to vector<16x10xf32>
    %5 = arith.addf %2, %4 : vector<16x10xf32>
    %c0_5 = arith.constant 0 : index
    %c0_6 = arith.constant 0 : index
    %6 = vector.load %arg4[%c0_5, %c0_6] : memref<16x10xf32, #tpu.memory_space<vmem>>, vector<16x10xf32>
    tpu.vector_store %arg4[%c0_5, %c0_6], %5 {strides = array<i32>} : memref<16x10xf32, #tpu.memory_space<vmem>>, vector<16x10xf32>,
    return
  }
  func.func @transform_0(%arg0: i32) -> (i32, i32) {
    %c0_i32 = arith.constant 0 : i32
    %c0_i32_0 = arith.constant 0 : i32
    return %arg0, %c0_i32 : i32, i32
  }
  func.func @transform_1(%arg0: i32) -> (i32, i32) {
    %c0_i32 = arith.constant 0 : i32
    %c0_i32_0 = arith.constant 0 : i32
    %c0_i32_1 = arith.constant 0 : i32
    return %c0_i32, %c0_i32_0 : i32, i32
  }
  func.func @transform_2(%arg0: i32) -> (i32, i32) {
    %c0_i32 = arith.constant 0 : i32
    %c0_i32_0 = arith.constant 0 : i32
    %c0_i32_1 = arith.constant 0 : i32
    return %c0_i32, %c0_i32_0 : i32, i32
  }
  func.func @transform_3(%arg0: i32) -> (i32, i32) {
    %c0_i32 = arith.constant 0 : i32
    %c0_i32_0 = arith.constant 0 : i32
    return %arg0, %c0_i32 : i32, i32
  }
}

</mosaic_0001>

<bundles_post_ra>
// kernel: tpu_custom_call.1
= control target key start
LH: loop header
LB: loop body
LE: loop exit
PB: predicated region body
PF: predicated region fallthrough
CT: control target
= control target key end

     0   :  { %8 = vsyncpa [#allocation3], 0  ;;  %s325_s0 = inlined_call_operand.hbm [shape: f32[16,16], index: 0, kind: input, shape index: {}]   ;;  %s326_s1 = inlined_call_operand.hbm [shape: f32[16,10], index: 1, kind: input, shape index: {}]   ;;  %s327_s2 = inlined_call_operand.vmem [shape: f32[1,10], index: 2, kind: input, shape index: {}]   ;;  %s328_s3 = inlined_call_operand.hbm [shape: f32[16,10], index: 3, kind: output, shape index: {}]  }
   0x1   :  { %9 = vsyncpa [#allocation6], 0 }
   0x2   :  { %10 = vsyncpa [#allocation4], 0  ;;  %s252_s12 = smov [#allocation2]   ;;  %s180_s16 = scalar_lea.hbm %s325_s0, 256 }
   0x3   :  { %s16_s13 = sshll.u32 %s252_s12, 4  ;;  %p181_p0 = scmp.ne.s32.totalorder %s325_s0, %s180_s16  ;;  %s17_s13 = int_to_ptr.vmem [resolvable:$true] %s16_s13 }
   0x4   :  { %p184_p1 = scmp.lt.u32.totalorder %s180_s16, %s325_s0 }
   0x6   :  { %p186_p2 = pnand %p184_p1, %p181_p0 }
   0x8   :  { %189 = shalt.err (!%p186_p2)
}
   0x9   :  { %s190_s21 = scalar_lea.vmem %s17_s13, 256  ;;  %p195_p4 = scmp.lt.s32.totalorder %s17_s13, %s17_s13 }
   0xa   :  { %p191_p3 = scmp.ne.s32.totalorder %s17_s13, %s190_s21  ;;  %p196_p5 = scmp.lt.s32.totalorder %s190_s21, %s190_s21 }
   0xc   :  { %p197_p6 = por %p196_p5, %p195_p4 }
   0xe   :  { %p198_p7 = pnand %p197_p6, %p191_p3 }
  0x10   :  { %201 = shalt.err (!%p198_p7)
}
  0x11   :  { %s253_s22 = smov 128   ;;  %s254_s23 = smov 8  }
  0x12   :  { %22 = dma.hbm_to_vmem [thread:$0]  %s325_s0, 256, %s17_s13, [#allocation3], %s253_s22, %s253_s22, %s254_s23  }
  0x13   :  { %s255_s26 = smov [#allocation5]   ;;  %s202_s30 = scalar_lea.hbm %s326_s1, 256 }
  0x14   :  { %s28_s27 = sshll.u32 %s255_s26, 4  ;;  %p203_p8 = scmp.ne.s32.totalorder %s326_s1, %s202_s30  ;;  %s29_s27 = int_to_ptr.vmem [resolvable:$true] %s28_s27 }
  0x15   :  { %p206_p9 = scmp.lt.u32.totalorder %s202_s30, %s326_s1 }
  0x17   :  { %p208_p10 = pnand %p206_p9, %p203_p8 }
  0x19   :  { %211 = shalt.err (!%p208_p10)
}
  0x1a   :  { %s212_s8 = scalar_lea.vmem %s29_s27, 256  ;;  %p217_p12 = scmp.lt.s32.totalorder %s29_s27, %s29_s27 }
  0x1b   :  { %p213_p11 = scmp.ne.s32.totalorder %s29_s27, %s212_s8  ;;  %p218_p13 = scmp.lt.s32.totalorder %s212_s8, %s212_s8 }
  0x1d   :  { %p219_p0 = por %p218_p13, %p217_p12 }
  0x1f   :  { %p220_p1 = pnand %p219_p0, %p213_p11 }
  0x21   :  { %223 = shalt.err (!%p220_p1)
}
  0x22   :  { %34 = dma.hbm_to_vmem [thread:$0]  %s326_s1, 256, %s29_s27, [#allocation6], %s253_s22, %s253_s22, %s254_s23  }
  0x23   :  { %246 = dma.done.wait [#allocation3], 256  }
  0x24   :  { %247 = vsyncadd [#allocation3], 4294967040 }
  0x25   :  { %248 = dma.done.wait [#allocation6], 256  }
  0x26   :  { %249 = vsyncadd [#allocation6], 4294967040  ;;  %vm54_vm0 = vcmask 130048   ;;  %v45_v0 = vld [vmem:[#allocation5] sm:$0xff]  ;;  %v46_v1 = vld [vmem:[#allocation5 + $0x8] sm:$0xff]  ;;  %s256_s12 = smov [#allocation7]  }
  0x27   :  { %v43_v2 = vld [vmem:[#allocation2] sm:$0xff]  ;;  %v171_v3 = vpack.c.bf16 %v46_v1, %v45_v0  ;;  %v44_v4 = vld [vmem:[#allocation2 + $0x8] sm:$0xff]  ;;  %s144_s1 = sshll.u32 %s256_s12, 4  ;;  %vm136_vm1 = vcmask 80896   ;;  %s145_s1 = int_to_ptr.vmem [resolvable:$true] %s144_s1 }
  0x28   :  { %168 = vmatprep.mubr.msk.f32.mxu0 %vm54_vm0, %v43_v2  ;;  %v157_v5 = vld [vmem:[%s327_s2] ss:$0 sm:$0xff]  ;;  %s224_s13 = scalar_lea.vmem %s145_s1, 256  ;;  %p229_p3 = scmp.lt.s32.totalorder %s145_s1, %s145_s1 }
  0x29   :  { %172 = vmatprep.subr.bf16.mxu0 %v171_v3  ;;  %p225_p2 = scmp.ne.s32.totalorder %s145_s1, %s224_s13  ;;  %p230_p4 = scmp.lt.s32.totalorder %s224_s13, %s224_s13 }
  0x2a   :  { %174 = vmatpush3.bf16.msra.mxu0 %v171_v3 }
  0x2b   :  { %p231_p5 = por %p230_p4, %p229_p3 }
  0x2d   :  { %169 = vmatmul.mubr.msk.f32.vlgmr.msra.gmra.mrb[0].mxu0 %vm54_vm0, %v44_v4  ;;  %p232_p6 = pnand %p231_p5, %p225_p2 }
 0x100   :  { %v170_v6 = vpop.f32.mrb[0].mxu0 }
 0x101   :  { %v133_v7 = vadd.f32 %v170_v6, %v157_v5  ;;  %v127_v8 = vpop.f32.mrb[1].mxu0 }
 0x102   :  { %v128_v9 = vadd.f32 %v157_v5, %v127_v8 }
 0x103   :  { %138 = vst.msk [vmem:[#allocation7 + $0x8] sm:$0xff] %vm136_vm1, %v133_v7 }
 0x104   :  { %137 = vst.msk [vmem:[#allocation7] sm:$0xff] %vm136_vm1, %v128_v9 }
 0x105   :  { %235 = shalt.err (!%p232_p6)
}
 0x106   :  { %s236_s2 = scalar_lea.hbm %s328_s3, 256 }
 0x107   :  { %p237_p7 = scmp.ne.s32.totalorder %s328_s3, %s236_s2  ;;  %p240_p8 = scmp.lt.u32.totalorder %s236_s2, %s328_s3 }
 0x109   :  { %p242_p9 = pnand %p240_p8, %p237_p7 }
 0x10b   :  { %245 = shalt.err (!%p242_p9)
}
 0x10c   :  { %150 = dma.vmem_to_hbm [thread:$0]  %s145_s1, 256, %s328_s3, [#allocation4], %s253_s22, %s253_s22, %s254_s23  }
 0x10d   :  { %250 = dma.done.wait [#allocation4], 256  }
 0x10e   :  { %251 = vsyncadd [#allocation4], 4294967040 }
 0x10f   :  { %154 = vsyncpa [#allocation3], 1 }
 0x110   :  { %155 = vsyncpa [#allocation6], 1 }
 0x111   :  { %156 = vsyncpa [#allocation4], 1 }

</bundles_post_ra>
